<compile_context>
chip_gen: v7x
topology: tpu7x:2x2x1
jax: 0.10.0
libtpu: 0.0.40
codegen_flags: <defaults>
</compile_context>

<pallas_src>
import jax
import jax.numpy as jnp
from jax.experimental import pallas as pl
from jax.experimental.pallas import tpu as pltpu

_OUT_PAD = 8     # pad action_dim (=2) to one full sublane: 32 B/row of writeback
_MAX_TB = 8192   # batch-tile cap; above ~4096 a vmem_limit hint is emitted


def _policy_kernel(x_ref, w1_ref, b1_ref, w2_ref, b2_ref, w3_ref, b3_ref, o_ref):
    # Layer 1: Linear(obs_dim -> hidden) + ReLU   (MXU matmul, f32 accumulate)
    h1 = jnp.dot(x_ref[...], w1_ref[...], preferred_element_type=jnp.float32)
    h1 = jnp.maximum(h1 + b1_ref[...], 0.0)

    # Layer 2: Linear(hidden -> hidden) + ReLU
    h2 = jnp.dot(h1, w2_ref[...], preferred_element_type=jnp.float32)
    h2 = jnp.maximum(h2 + b2_ref[...], 0.0)

    # Layer 3: Linear(hidden -> 8 padded) + Tanh (tanh on the EUP).
    # Padded columns have zero weight/bias -> tanh(0)=0, sliced off in wrapper.
    h3 = jnp.dot(h2, w3_ref[...], preferred_element_type=jnp.float32)
    o_ref[...] = jnp.tanh(h3 + b3_ref[...]).astype(o_ref.dtype)


def _round_up(n, m):
    return ((n + m - 1) // m) * m


def prepare_params(params, out_pad=_OUT_PAD):
    """Pad the final layer once, OUTSIDE the hot path. Idempotent."""
    if "action_dim" in params:
        return params
    w3, b3 = params["w3"], params["b3"]
    action_dim = w3.shape[1]
    prepared = dict(params)
    prepared["w3"] = jnp.pad(w3, ((0, 0), (0, out_pad - action_dim)))
    prepared["b3"] = jnp.pad(b3, ((0, 0), (0, out_pad - action_dim)))
    prepared["action_dim"] = action_dim
    return prepared


def simple_policy_network(x, params, *, block_b=4096):
    """x: (B, obs_dim) float32. params: (in,out) weights, (1,out) biases
    (raw or already passed through prepare_params)."""
    params = prepare_params(params)  # no-op if already prepared
    w1, b1 = params["w1"], params["b1"]
    w2, b2 = params["w2"], params["b2"]
    w3, b3 = params["w3"], params["b3"]          # padded to _OUT_PAD columns
    action_dim = params["action_dim"]

    B, obs_dim = x.shape
    hidden = w1.shape[1]
    out_pad = w3.shape[1]

    # --- Batch tiling: TB rows per grid step (multiple of 8 sublanes) -------
    tb = _round_up(min(block_b, _MAX_TB, _round_up(B, 8)), 8)
    # v7x megacore: keep >= 2 grid steps once the batch is big enough to matter
    # so the "parallel" axis spans both TensorCores (no-op on v5e/v6e).
    if B >= 2048 and pl.cdiv(B, tb) < 2:
        tb = _round_up(pl.cdiv(B, 2), 8)
    grid = (pl.cdiv(B, tb),)  # ragged last block handled by Pallas masking

    # Weights/biases: full-array block, constant block index -> fetched once,
    # VMEM resident across the whole grid (~25 KiB total).
    def const_spec(a):
        nd = a.ndim
        return pl.BlockSpec(a.shape, lambda i, _nd=nd: (0,) * _nd)

    # Double-buffered x/out tiles lane-pad to 128 f32 in VMEM (512 B/row each).
    tile_vmem = 2 * 2 * tb * 128 * 4
    weight_vmem = 2 * 4 * (obs_dim * hidden + hidden * hidden
                           + hidden * out_pad + 2 * hidden + out_pad)
    vmem_needed = tile_vmem + weight_vmem + (2 << 20)  # + compiler slack
    vmem_limit = vmem_needed if vmem_needed > (16 << 20) else None

    # Advisory cost hint for XLA's scheduler around the custom call.
    flops = 2 * B * (obs_dim * hidden + hidden * hidden + hidden * out_pad)
    bytes_accessed = 4 * (
        B * obs_dim + B * out_pad
        + obs_dim * hidden + hidden
        + hidden * hidden + hidden
        + hidden * out_pad + out_pad
    )
    cost = pl.CostEstimate(flops=flops, transcendentals=B * out_pad,
                           bytes_accessed=bytes_accessed)

    out = pl.pallas_call(
        _policy_kernel,
        out_shape=jax.ShapeDtypeStruct((B, out_pad), x.dtype),
        grid=grid,
        in_specs=[
            pl.BlockSpec((tb, obs_dim), lambda i: (i, 0)),  # x tile
            const_spec(w1), const_spec(b1),
            const_spec(w2), const_spec(b2),
            const_spec(w3), const_spec(b3),
        ],
        out_specs=pl.BlockSpec((tb, out_pad), lambda i: (i, 0)),
        compiler_params=pltpu.CompilerParams(
            dimension_semantics=("parallel",),  # shard batch tiles across TCs (v7x)
            vmem_limit_bytes=vmem_limit,
        ),
        cost_estimate=cost,
    )(x, w1, b1, w2, b2, w3, b3)

    return out[:, :action_dim]


def init_params(key, obs_dim=10, action_dim=2, hidden_size=64):
    """Deterministic synthetic init (PyTorch-Linear-like uniform fan-in scaling)."""
    ks = jax.random.split(key, 6)

    def lin(kw, kb, fan_in, fan_out):
        bound = 1.0 / jnp.sqrt(float(fan_in))
        # stored as (in, out) so the kernel computes x @ W + b
        w = jax.random.uniform(kw, (fan_in, fan_out), jnp.float32, -bound, bound)
        b = jax.random.uniform(kb, (1, fan_out), jnp.float32, -bound, bound)
        return w, b

    w1, b1 = lin(ks[0], ks[1], obs_dim, hidden_size)
    w2, b2 = lin(ks[2], ks[3], hidden_size, hidden_size)
    w3, b3 = lin(ks[4], ks[5], hidden_size, action_dim)
    return {"w1": w1, "b1": b1, "w2": w2, "b2": b2, "w3": w3, "b3": b3}


def _reference(x, p):
    h = jnp.maximum(x @ p["w1"] + p["b1"], 0.0)
    h = jnp.maximum(h @ p["w2"] + p["b2"], 0.0)
    return jnp.tanh(h @ p["w3"] + p["b3"])


if __name__ == "__main__":
    key = jax.random.PRNGKey(0)
    k_x, k_x2, k_x3, k_p = jax.random.split(key, 4)

    obs_dim, action_dim, hidden_size = 10, 2, 64
    params = init_params(k_p, obs_dim, action_dim, hidden_size)
    prepared = prepare_params(params)  # pad final layer once, outside the hot path

    # Small batch (single grid step).
    x = jax.random.normal(k_x, (8, obs_dim), jnp.float32)
    out = jax.block_until_ready(simple_policy_network(x, prepared))
    ref = _reference(x, params)
    assert out.shape == (8, action_dim)
    assert jnp.allclose(out, ref, atol=1e-5, rtol=1e-5)

    # Ragged batch: multi-step grid, masked partial last block (no wrapper pad of x).
    x2 = jax.random.normal(k_x2, (37, obs_dim), jnp.float32)
    out2 = jax.block_until_ready(simple_policy_network(x2, prepared, block_b=16))
    ref2 = _reference(x2, params)
    assert out2.shape == (37, action_dim)
    assert jnp.allclose(out2, ref2, atol=1e-5, rtol=1e-5)

    # Larger ragged batch: exercises the >=2-grid-step (v7x megacore) split path.
    x3 = jax.random.normal(k_x3, (2050, obs_dim), jnp.float32)
    out3 = jax.block_until_ready(simple_policy_network(x3, prepared))
    ref3 = _reference(x3, params)
    assert out3.shape == (2050, action_dim)
    assert jnp.allclose(out3, ref3, atol=1e-5, rtol=1e-5)

    print("KERNEL_OK")
</pallas_src>

<mosaic_0001>
module attributes {stable_mosaic.version = 11 : i64} {
  func.func @_policy_kernel(%arg0: i32, %arg1: memref<8x10xf32, #tpu.memory_space<vmem>>, %arg2: memref<10x64xf32, #tpu.memory_space<vmem>>, %arg3: memref<1x64xf32, #tpu.memory_space<vmem>>, %arg4: memref<64x64xf32, #tpu.memory_space<vmem>>, %arg5: memref<1x64xf32, #tpu.memory_space<vmem>>, %arg6: memref<64x8xf32, #tpu.memory_space<vmem>>, %arg7: memref<1x8xf32, #tpu.memory_space<vmem>>, %arg8: memref<8x8xf32, #tpu.memory_space<vmem>>) attributes {dimension_semantics = [#tpu.dimension_semantics<parallel>], iteration_bounds = array<i64: 1>, scalar_prefetch = 0 : i64, scratch_operands = 0 : i64, tpu.core_type = #tpu.core_type<tc>, window_params = [{transform_indices = @transform_0, window_bounds = array<i64: 8, 10>}, {pipeline_mode = #tpu.pipeline_mode<synchronous>, transform_indices = @transform_1, window_bounds = array<i64: 10, 64>}, {pipeline_mode = #tpu.pipeline_mode<synchronous>, transform_indices = @transform_2, window_bounds = array<i64: 1, 64>}, {pipeline_mode = #tpu.pipeline_mode<synchronous>, transform_indices = @transform_3, window_bounds = array<i64: 64, 64>}, {pipeline_mode = #tpu.pipeline_mode<synchronous>, transform_indices = @transform_4, window_bounds = array<i64: 1, 64>}, {pipeline_mode = #tpu.pipeline_mode<synchronous>, transform_indices = @transform_5, window_bounds = array<i64: 64, 8>}, {pipeline_mode = #tpu.pipeline_mode<synchronous>, transform_indices = @transform_6, window_bounds = array<i64: 1, 8>}, {transform_indices = @transform_7, window_bounds = array<i64: 8, 8>}]} {
    %c0 = arith.constant 0 : index
    %c0_0 = arith.constant 0 : index
    %0 = vector.load %arg1[%c0, %c0_0] : memref<8x10xf32, #tpu.memory_space<vmem>>, vector<8x10xf32>
    %c0_1 = arith.constant 0 : index
    %c0_2 = arith.constant 0 : index
    %1 = vector.load %arg2[%c0_1, %c0_2] : memref<10x64xf32, #tpu.memory_space<vmem>>, vector<10x64xf32>
    %cst = arith.constant dense<0.000000e+00> : vector<8x64xf32>
    %2 = tpu.matmul %0, %1, %cst {dimension_numbers = #tpu.dot_dimension_numbers<[1], [0], [0], [1], [0, 0, 1, 1], [], []>} : vector<8x10xf32>, vector<10x64xf32>, vector<8x64xf32> -> vector<8x64xf32>
    %c0_3 = arith.constant 0 : index
    %c0_4 = arith.constant 0 : index
    %3 = vector.load %arg3[%c0_3, %c0_4] : memref<1x64xf32, #tpu.memory_space<vmem>>, vector<1x64xf32>
    %4 = vector.broadcast %3 : vector<1x64xf32> to vector<8x64xf32>
    %5 = arith.addf %2, %4 : vector<8x64xf32>
    %cst_5 = arith.constant 0.000000e+00 : f32
    %6 = vector.broadcast %cst_5 : f32 to vector<8x64xf32>
    %7 = arith.maximumf %5, %6 : vector<8x64xf32>
    %c0_6 = arith.constant 0 : index
    %c0_7 = arith.constant 0 : index
    %8 = vector.load %arg4[%c0_6, %c0_7] : memref<64x64xf32, #tpu.memory_space<vmem>>, vector<64x64xf32>
    %cst_8 = arith.constant dense<0.000000e+00> : vector<8x64xf32>
    %9 = tpu.matmul %7, %8, %cst_8 {dimension_numbers = #tpu.dot_dimension_numbers<[1], [0], [0], [1], [0, 0, 1, 1], [], []>} : vector<8x64xf32>, vector<64x64xf32>, vector<8x64xf32> -> vector<8x64xf32>
    %c0_9 = arith.constant 0 : index
    %c0_10 = arith.constant 0 : index
    %10 = vector.load %arg5[%c0_9, %c0_10] : memref<1x64xf32, #tpu.memory_space<vmem>>, vector<1x64xf32>
    %11 = vector.broadcast %10 : vector<1x64xf32> to vector<8x64xf32>
    %12 = arith.addf %9, %11 : vector<8x64xf32>
    %cst_11 = arith.constant 0.000000e+00 : f32
    %13 = vector.broadcast %cst_11 : f32 to vector<8x64xf32>
    %14 = arith.maximumf %12, %13 : vector<8x64xf32>
    %c0_12 = arith.constant 0 : index
    %c0_13 = arith.constant 0 : index
    %15 = vector.load %arg6[%c0_12, %c0_13] : memref<64x8xf32, #tpu.memory_space<vmem>>, vector<64x8xf32>
    %cst_14 = arith.constant dense<0.000000e+00> : vector<8x8xf32>
    %16 = tpu.matmul %14, %15, %cst_14 {dimension_numbers = #tpu.dot_dimension_numbers<[1], [0], [0], [1], [0, 0, 1, 1], [], []>} : vector<8x64xf32>, vector<64x8xf32>, vector<8x8xf32> -> vector<8x8xf32>
    %c0_15 = arith.constant 0 : index
    %c0_16 = arith.constant 0 : index
    %17 = vector.load %arg7[%c0_15, %c0_16] : memref<1x8xf32, #tpu.memory_space<vmem>>, vector<1x8xf32>
    %18 = vector.broadcast %17 : vector<1x8xf32> to vector<8x8xf32>
    %19 = arith.addf %16, %18 : vector<8x8xf32>
    %20 = math.tanh %19 : vector<8x8xf32>
    %c0_17 = arith.constant 0 : index
    %c0_18 = arith.constant 0 : index
    %21 = vector.load %arg8[%c0_17, %c0_18] : memref<8x8xf32, #tpu.memory_space<vmem>>, vector<8x8xf32>
    tpu.vector_store %arg8[%c0_17, %c0_18], %20 {strides = array<i32>} : memref<8x8xf32, #tpu.memory_space<vmem>>, vector<8x8xf32>,
    return
  }
  func.func @transform_0(%arg0: i32) -> (i32, i32) {
    %c0_i32 = arith.constant 0 : i32
    %c0_i32_0 = arith.constant 0 : i32
    return %arg0, %c0_i32 : i32, i32
  }
  func.func @transform_1(%arg0: i32) -> (i32, i32) {
    %c0_i32 = arith.constant 0 : i32
    %c0_i32_0 = arith.constant 0 : i32
    %c0_i32_1 = arith.constant 0 : i32
    return %c0_i32, %c0_i32_0 : i32, i32
  }
  func.func @transform_2(%arg0: i32) -> (i32, i32) {
    %c0_i32 = arith.constant 0 : i32
    %c0_i32_0 = arith.constant 0 : i32
    %c0_i32_1 = arith.constant 0 : i32
    return %c0_i32, %c0_i32_0 : i32, i32
  }
  func.func @transform_3(%arg0: i32) -> (i32, i32) {
    %c0_i32 = arith.constant 0 : i32
    %c0_i32_0 = arith.constant 0 : i32
    %c0_i32_1 = arith.constant 0 : i32
    return %c0_i32, %c0_i32_0 : i32, i32
  }
  func.func @transform_4(%arg0: i32) -> (i32, i32) {
    %c0_i32 = arith.constant 0 : i32
    %c0_i32_0 = arith.constant 0 : i32
    %c0_i32_1 = arith.constant 0 : i32
    return %c0_i32, %c0_i32_0 : i32, i32
  }
  func.func @transform_5(%arg0: i32) -> (i32, i32) {
    %c0_i32 = arith.constant 0 : i32
    %c0_i32_0 = arith.constant 0 : i32
    %c0_i32_1 = arith.constant 0 : i32
    return %c0_i32, %c0_i32_0 : i32, i32
  }
  func.func @transform_6(%arg0: i32) -> (i32, i32) {
    %c0_i32 = arith.constant 0 : i32
    %c0_i32_0 = arith.constant 0 : i32
    %c0_i32_1 = arith.constant 0 : i32
    return %c0_i32, %c0_i32_0 : i32, i32
  }
  func.func @transform_7(%arg0: i32) -> (i32, i32) {
    %c0_i32 = arith.constant 0 : i32
    %c0_i32_0 = arith.constant 0 : i32
    return %arg0, %c0_i32 : i32, i32
  }
}

</mosaic_0001>

<bundles_post_ra>
// kernel: tpu_custom_call.1
= control target key start
LH: loop header
LB: loop body
LE: loop exit
PB: predicated region body
PF: predicated region fallthrough
CT: control target
= control target key end

     0   :  { %12 = vsyncpa [#allocation3], 0  ;;  %s617_s0 = inlined_call_operand.hbm [shape: f32[8,10], index: 0, kind: input, shape index: {}]   ;;  %s618_s1 = inlined_call_operand.vmem [shape: f32[10,64], index: 1, kind: input, shape index: {}]   ;;  %s619_s2 = inlined_call_operand.vmem [shape: f32[1,64], index: 2, kind: input, shape index: {}]   ;;  %s620_s3 = inlined_call_operand.vmem [shape: f32[64,64], index: 3, kind: input, shape index: {}]   ;;  %s621_s4 = inlined_call_operand.vmem [shape: f32[1,64], index: 4, kind: input, shape index: {}]   ;;  %s622_s5 = inlined_call_operand.vmem [shape: f32[64,8], index: 5, kind: input, shape index: {}]   ;;  %s623_s6 = inlined_call_operand.vmem [shape: f32[1,8], index: 6, kind: input, shape index: {}]   ;;  %s624_s7 = inlined_call_operand.hbm [shape: f32[8,8], index: 7, kind: output, shape index: {}]  }
   0x1   :  { %13 = vsyncpa [#allocation4], 0  ;;  %s481_s24 = smov [#allocation2]   ;;  %s433_s28 = scalar_lea.hbm %s617_s0, 128 }
   0x2   :  { %s20_s25 = sshll.u32 %s481_s24, 4  ;;  %p434_p0 = scmp.ne.s32.totalorder %s617_s0, %s433_s28  ;;  %s21_s25 = int_to_ptr.vmem [resolvable:$true] %s20_s25 }
   0x3   :  { %p437_p1 = scmp.lt.u32.totalorder %s433_s28, %s617_s0 }
   0x5   :  { %p439_p2 = pnand %p437_p1, %p434_p0 }
   0x7   :  { %442 = shalt.err (!%p439_p2)
}
   0x8   :  { %s443_s10 = scalar_lea.vmem %s21_s25, 128  ;;  %p448_p4 = scmp.lt.s32.totalorder %s21_s25, %s21_s25 }
   0x9   :  { %p444_p3 = scmp.ne.s32.totalorder %s21_s25, %s443_s10  ;;  %p449_p5 = scmp.lt.s32.totalorder %s443_s10, %s443_s10 }
   0xb   :  { %p450_p6 = por %p449_p5, %p448_p4 }
   0xd   :  { %p451_p7 = pnand %p450_p6, %p444_p3 }
   0xf   :  { %454 = shalt.err (!%p451_p7)
}
  0x10   :  { %23 = dma.hbm_to_vmem [thread:$0]  %s617_s0, 128, %s21_s25, [#allocation3]  }
  0x11   :  { %477 = dma.done.wait [#allocation3], 128  }
  0x12   :  { %478 = vsyncadd [#allocation3], 4294967168  ;;  %v482_v0 = vmov 0.0|0.0   ;;  %vm483_vm0 = vmmov 0   ;;  %v484_v1 = vmov 0.0   ;;  %vm53_vm1 = vcmask 1041408  }
  0x13   :  { %397 = vmatprep.subr.bf16.mxu0 %v482_v0  ;;  %401 = vmatprep.subr.bf16.mxu1 %v482_v0  ;;  %v40_v2 = vld [vmem:[%s618_s1] sm:$0xff]  ;;  %v41_v3 = vld [vmem:[%s618_s1 + $0x8] sm:$0x3]  ;;  %vm485_vm2 = vmmov 1   ;;  %v130_v7 = vld [vmem:[%s620_s3 + $0x10] sm:$0xff]  ;;  %vm49_vm4 = vcmask 80896  }
  0x14   :  { %356 = vmatprep.mubr.msk.f32.mxu0 %vm483_vm0, %v484_v1  ;;  %375 = vmatprep.mubr.msk.f32.mxu1 %vm483_vm0, %v484_v1  ;;  %vm399_vm3 = vmpackc.low %vm53_vm1, %vm485_vm2  ;;  %v398_v4 = vpack.c.bf16 %v41_v3, %v40_v2  ;;  %v128_v5 = vld [vmem:[%s620_s3] sm:$0xff]  ;;  %v129_v6 = vld [vmem:[%s620_s3 + $0x8] sm:$0xff]  ;;  %vm143_vm5 = vcmask 523264   ;;  %vm307_vm6 = vcmask 64512  }
  0x15   :  { %v402_v8 = vpack.c.bf16 %v129_v6, %v128_v5  ;;  %v131_v9 = vld [vmem:[%s620_s3 + $0x18] sm:$0xff]  ;;  %v39_v10 = vld [vmem:[#allocation2] sm:$0xff]  ;;  %v133_v13 = vld [vmem:[%s620_s3 + $0x28] sm:$0xff] }
  0x16   :  { %400 = vmatpush3.bf16.msk.msra.mxu0 %vm399_vm3, %v398_v4  ;;  %v405_v11 = vpack.c.bf16 %v131_v9, %v130_v7  ;;  %v132_v12 = vld [vmem:[%s620_s3 + $0x20] sm:$0xff]  ;;  %v134_v15 = vld [vmem:[%s620_s3 + $0x30] sm:$0xff]  ;;  %v135_v16 = vld [vmem:[%s620_s3 + $0x38] sm:$0xff] }
  0x17   :  { %403 = vmatpush3.bf16.msra.mxu1 %v402_v8  ;;  %413 = vmatprep.subr.bf16.mxu0 %v482_v0  ;;  %v408_v14 = vpack.c.bf16 %v133_v13, %v132_v12  ;;  %v411_v17 = vpack.c.bf16 %v135_v16, %v134_v15  ;;  %v218_v18 = vld [vmem:[%s622_s5] sm:$0xff]  ;;  %v219_v19 = vld [vmem:[%s622_s5 + $0x8] sm:$0xff]  ;;  %v220_v20 = vld [vmem:[%s622_s5 + $0x10] sm:$0xff] }
  0x18   :  { %404 = vmatprep.subr.bf16.mxu1 %v482_v0  ;;  %v414_v21 = vpack.c.bf16 %v219_v19, %v218_v18  ;;  %v221_v22 = vld [vmem:[%s622_s5 + $0x18] sm:$0xff]  ;;  %v222_v24 = vld [vmem:[%s622_s5 + $0x20] sm:$0xff]  ;;  %v223_v25 = vld [vmem:[%s622_s5 + $0x28] sm:$0xff] }
  0x19   :  { %357 = vmatmul.mubr.msk.f32.vlgmr.msra.gmra.mrb[0].mxu0 %vm49_vm4, %v39_v10  ;;  %v417_v23 = vpack.c.bf16 %v221_v22, %v220_v20  ;;  %v420_v26 = vpack.c.bf16 %v223_v25, %v222_v24  ;;  %v324_v27 = vld [vmem:[%s619_s2] ss:$0 sm:$0xff]  ;;  %v224_v32 = vld [vmem:[%s622_s5 + $0x30] sm:$0xff]  ;;  %v225_v33 = vld [vmem:[%s622_s5 + $0x38] sm:$0xff]  ;;  %s486_s5 = smov [#allocation5]  }
  0x1a   :  { %394 = vmatprep.mubr.msk.f32.mxu0 %vm483_vm0, %v484_v1  ;;  %415 = vmatpush3.bf16.msra.mxu0 %v414_v21  ;;  %v423_v34 = vpack.c.bf16 %v225_v33, %v224_v32  ;;  %v327_v35 = vld [vmem:[%s621_s4] ss:$0 sm:$0xff]  ;;  %s315_s26 = sshll.u32 %s486_s5, 4  ;;  %s316_s26 = int_to_ptr.vmem [resolvable:$true] %s315_s26 }
  0x1b   :  { %406 = vmatpush3.bf16.msra.mxu1 %v405_v11  ;;  %416 = vmatprep.subr.bf16.mxu0 %v482_v0  ;;  %v329_v40 = vld [vmem:[%s623_s6] ss:$0 sm:$0xff]  ;;  %s455_s4 = scalar_lea.vmem %s316_s26, 128  ;;  %p460_p9 = scmp.lt.s32.totalorder %s316_s26, %s316_s26 }
  0x1c   :  { %407 = vmatprep.subr.bf16.mxu1 %v482_v0  ;;  %p456_p8 = scmp.ne.s32.totalorder %s316_s26, %s455_s4  ;;  %p461_p10 = scmp.lt.s32.totalorder %s455_s4, %s455_s4 }
  0x1e   :  { %418 = vmatpush3.bf16.msra.mxu0 %v417_v23  ;;  %p462_p11 = por %p461_p10, %p460_p9 }
  0x1f   :  { %409 = vmatpush3.bf16.msra.mxu1 %v408_v14  ;;  %419 = vmatprep.subr.bf16.mxu0 %v482_v0 }
  0x20   :  { %410 = vmatprep.subr.bf16.mxu1 %v482_v0  ;;  %p463_p12 = pnand %p462_p11, %p456_p8 }
  0x22   :  { %421 = vmatpush3.bf16.msra.mxu0 %v420_v26 }
  0x23   :  { %412 = vmatpush3.bf16.msra.mxu1 %v411_v17  ;;  %422 = vmatprep.subr.bf16.mxu0 %v482_v0 }
  0x26   :  { %424 = vmatpush3.bf16.msra.mxu0 %v423_v34 }
  0xec   :  { %v123_v28 = vpop.f32.mrb[0].mxu0 }
  0xed   :  { %v124_v29 = vadd.f32 %v324_v27, %v123_v28  ;;  %v358_v30 = vpop.f32.mrb[1].mxu0 }
  0xef   :  { %v127_v31 = vmax.f32 %v124_v29, 0.0 }
  0xf1   :  { %376 = vmatmul.mubr.msk.f32.vlgmr.msra.gmra.mrb[0].mxu1 %vm143_vm5, %v127_v31 }
 0x1c4   :  { %v213_v36 = vpop.f32.mrb[0].mxu1 }
 0x1c5   :  { %v214_v37 = vadd.f32 %v327_v35, %v213_v36  ;;  %v377_v38 = vpop.f32.mrb[1].mxu1 }
 0x1c7   :  { %v217_v39 = vmax.f32 %v214_v37, 0.0 }
 0x1c9   :  { %395 = vmatmul.mubr.msk.f32.vlgmr.msra.gmra.mrb[2].mxu0 %vm143_vm5, %v217_v39 }
 0x29c   :  { %v302_v41 = vpop.f32.mrb[2].mxu0 }
 0x29d   :  { %v303_v42 = vadd.f32 %v329_v40, %v302_v41  ;;  %v396_v43 = vpop.f32.mrb[3].mxu0 }
 0x29f   :  { %431 = vtanh.f32 %v303_v42 }
 0x2a9   :  { %v432_v44 = vpop.eup %431 }
 0x2aa   :  { %308 = vst.msk [vmem:[#allocation5] sm:$0xff] %vm307_vm6, %v432_v44 }
 0x2ab   :  { %466 = shalt.err (!%p463_p12)
}
 0x2ac   :  { %s467_s6 = scalar_lea.hbm %s624_s7, 128 }
 0x2ad   :  { %p468_p13 = scmp.ne.s32.totalorder %s624_s7, %s467_s6  ;;  %p471_p0 = scmp.lt.u32.totalorder %s467_s6, %s624_s7 }
 0x2af   :  { %p473_p1 = pnand %p471_p0, %p468_p13 }
 0x2b1   :  { %476 = shalt.err (!%p473_p1)
}
 0x2b2   :  { %318 = dma.vmem_to_hbm [thread:$0]  %s316_s26, 128, %s624_s7, [#allocation4]  }
 0x2b3   :  { %479 = dma.done.wait [#allocation4], 128  }
 0x2b4   :  { %480 = vsyncadd [#allocation4], 4294967168 }
 0x2b5   :  { %322 = vsyncpa [#allocation3], 1 }
 0x2b6   :  { %323 = vsyncpa [#allocation4], 1 }

</bundles_post_ra>
